<compile_context>
chip_gen: v6e
topology: v6e:2x2x1
jax: 0.10.0
libtpu: 0.0.40
codegen_flags: <defaults>
</compile_context>

<pallas_src>
import functools

import jax
import jax.numpy as jnp
from jax.experimental import pallas as pl
from jax.experimental.pallas import tpu as pltpu

_BN_EPS = 1e-5


# --------------------------------------------------------------------------
# shared f32 epilogue: optional train-mode BatchNorm (per-column stats) + act
# --------------------------------------------------------------------------
def _epilogue(y, act, bn):
    if bn:
        m = y.shape[0]
        mean = jnp.sum(y, axis=0, keepdims=True) * (1.0 / m)
        var = jnp.sum((y - mean) ** 2, axis=0, keepdims=True) * (1.0 / m)
        y = (y - mean) * jax.lax.rsqrt(var + _BN_EPS)
    if act == "relu":
        y = jnp.maximum(y, 0.0)
    elif act == "tanh":
        y = jnp.tanh(y)
    return y


# --------------------------------------------------------------------------
# fused matmul (+ optional BatchNorm + activation) kernels
# --------------------------------------------------------------------------
def _mm_fused_kernel(a_ref, b_ref, o_ref, *, act, bn):
    # single K step: no accumulator scratch, write straight to the output block
    y = jnp.dot(a_ref[...], b_ref[...], preferred_element_type=jnp.float32)
    o_ref[...] = _epilogue(y, act, bn).astype(o_ref.dtype)


def _mm_fused_kernel_acc(a_ref, b_ref, o_ref, acc_ref, *, act, bn):
    @pl.when(pl.program_id(1) == 0)
    def _():
        acc_ref[...] = jnp.zeros_like(acc_ref)

    acc_ref[...] += jnp.dot(a_ref[...], b_ref[...],
                            preferred_element_type=jnp.float32)

    @pl.when(pl.program_id(1) == pl.num_programs(1) - 1)
    def _():
        o_ref[...] = _epilogue(acc_ref[...], act, bn).astype(o_ref.dtype)


def _pick_tiles(K, Np, max_b_bytes=6 * 1024 * 1024):
    """N tile: full N when small, halved when >=256 (>=2 parallel blocks for
    v7x megacore), capped at 1024.  K split (rarely needed) keeps tk a
    multiple of 128 so the A block's last dim stays legal."""
    if Np > 1024:
        tn = 1024
    elif Np >= 256 and Np % 256 == 0:
        tn = Np // 2
    else:
        tn = Np
    tk = K
    while tk * tn * 2 > max_b_bytes:
        for d in (2, 3, 5, 7):
            if tk % d == 0 and (tk // d) % 128 == 0:
                tk //= d
                break
        else:
            break
    return tk, tn


def matmul_fused(a, b, act="none", bn=False, out_dtype=jnp.float32,
                 split_m=False):
    """act(BN(a @ b)).  a:(M,K), b:(K,N) -> out_dtype (M,N).

    bf16 operands, f32 accumulation + f32 epilogue.  N is zero-padded to a
    multiple of 128 for lane-dense stores and sliced back.  M stays a single
    block when bn=True (per-channel stats need the whole batch); with
    split_m=True (and bn=False) M is padded and split into 2 parallel blocks
    so v7x's second TensorCore is not idle."""
    M, K = a.shape
    K2, N = b.shape
    assert K == K2
    Np = max(128, ((N + 127) // 128) * 128)
    if Np != N:
        b = jnp.pad(b, ((0, 0), (0, Np - N)))
    a = a.astype(jnp.bfloat16)
    b = b.astype(jnp.bfloat16)
    tk, tn = _pick_tiles(K, Np)
    nj, nk = Np // tn, K // tk

    tm, ni, Mp = M, 1, M
    if split_m and not bn and nk == 1 and M >= 512:
        tm = (-(-M // 16)) * 8          # 2 blocks, each a multiple of 8 rows
        Mp = 2 * tm
        ni = 2
        if Mp != M:
            a = jnp.pad(a, ((0, Mp - M), (0, 0)))

    if nk == 1:
        out = pl.pallas_call(
            functools.partial(_mm_fused_kernel, act=act, bn=bn),
            out_shape=jax.ShapeDtypeStruct((Mp, Np), out_dtype),
            grid_spec=pltpu.PrefetchScalarGridSpec(
                num_scalar_prefetch=0, grid=(ni, nj),
                in_specs=[pl.BlockSpec((tm, K), lambda i, j: (i, 0)),
                          pl.BlockSpec((K, tn), lambda i, j: (0, j))],
                out_specs=pl.BlockSpec((tm, tn), lambda i, j: (i, j))),
            compiler_params=pltpu.CompilerParams(
                dimension_semantics=("parallel", "parallel")),
        )(a, b)
    else:
        out = pl.pallas_call(
            functools.partial(_mm_fused_kernel_acc, act=act, bn=bn),
            out_shape=jax.ShapeDtypeStruct((M, Np), out_dtype),
            grid_spec=pltpu.PrefetchScalarGridSpec(
                num_scalar_prefetch=0, grid=(nj, nk),
                in_specs=[pl.BlockSpec((M, tk), lambda j, k: (0, k)),
                          pl.BlockSpec((tk, tn), lambda j, k: (k, j))],
                out_specs=pl.BlockSpec((M, tn), lambda j, k: (0, j)),
                scratch_shapes=[pltpu.VMEM((M, tn), jnp.float32)]),
            compiler_params=pltpu.CompilerParams(
                dimension_semantics=("parallel", "arbitrary")),
        )(a, b)
    if Mp != M or Np != N:
        out = out[:M, :N]
    return out


# --------------------------------------------------------------------------
# fused mu/sigma projection + reparameterization kernel
# --------------------------------------------------------------------------
def _head_kernel(a_ref, w_ref, eps_ref, mv_ref, z_ref, acc_ref):
    k = pl.program_id(0)

    @pl.when(k == 0)
    def _():
        acc_ref[...] = jnp.zeros_like(acc_ref)

    acc_ref[...] += jnp.dot(a_ref[...], w_ref[...],
                            preferred_element_type=jnp.float32)

    @pl.when(k == pl.num_programs(0) - 1)
    def _():
        acc = acc_ref[...]
        nz = eps_ref.shape[1]
        mu = acc[:, :nz]
        logvar = acc[:, nz:]
        mv_ref[...] = acc
        z_ref[...] = eps_ref[...] * jnp.exp(logvar * 0.5) + mu


def head_matmul_reparam(a, w, eps):
    """a:(B,K) flattened encoder features, w:(K, 2Z)=[mu_w | sigma_w],
    eps:(B,Z).  Returns (mu||logvar):(B,2Z) f32 and z:(B,Z) f32 in one kernel."""
    M, K = a.shape
    _, N2 = w.shape
    Z = N2 // 2
    a = a.astype(jnp.bfloat16)
    w = w.astype(jnp.bfloat16)
    tk = K
    while tk * N2 * 2 > 8 * 1024 * 1024 and tk % 2 == 0 and (tk // 2) % 128 == 0:
        tk //= 2
    nk = K // tk
    return pl.pallas_call(
        _head_kernel,
        out_shape=(jax.ShapeDtypeStruct((M, N2), jnp.float32),
                   jax.ShapeDtypeStruct((M, Z), jnp.float32)),
        grid_spec=pltpu.PrefetchScalarGridSpec(
            num_scalar_prefetch=0, grid=(nk,),
            in_specs=[pl.BlockSpec((M, tk), lambda k: (0, k)),
                      pl.BlockSpec((tk, N2), lambda k: (k, 0)),
                      pl.BlockSpec((M, Z), lambda k: (0, 0))],
            out_specs=(pl.BlockSpec((M, N2), lambda k: (0, 0)),
                       pl.BlockSpec((M, Z), lambda k: (0, 0))),
            scratch_shapes=[pltpu.VMEM((M, N2), jnp.float32)]),
        compiler_params=pltpu.CompilerParams(
            dimension_semantics=("arbitrary",),
            vmem_limit_bytes=32 * 1024 * 1024),
    )(a, w, eps)


# --------------------------------------------------------------------------
# single-pass fused BatchNorm + activation (only used for decoder layer 1)
# --------------------------------------------------------------------------
def _bn_act_kernel(x_ref, o_ref, *, act):
    y = x_ref[...].astype(jnp.float32)
    o_ref[...] = _epilogue(y, act, True).astype(o_ref.dtype)


def bn_act(x2d, act="relu", out_dtype=jnp.bfloat16):
    """Train-mode BatchNorm2d (per-column batch stats, gamma=1, beta=0) + act,
    one VMEM block, lane-dense (last dim >= 128) in/out."""
    M, N = x2d.shape
    return pl.pallas_call(
        functools.partial(_bn_act_kernel, act=act),
        out_shape=jax.ShapeDtypeStruct((M, N), out_dtype),
    )(x2d)


# --------------------------------------------------------------------------
# ConvTranspose(s=2) matmul with masked, per-channel BN + ReLU in the epilogue
# --------------------------------------------------------------------------
def _ct_bn_relu_kernel(a_ref, w_ref, r_ref, c_ref, o_ref, *, B, H, W, Cout):
    y = jnp.dot(a_ref[...], w_ref[...], preferred_element_type=jnp.float32)
    N = 4 * Cout
    r = r_ref[...]                                   # (M,1) grid row in [0,H]
    c = c_ref[...]                                   # (M,1) grid col in [0,W]
    col = jax.lax.broadcasted_iota(jnp.int32, (1, N), 1)
    par = col // Cout                                # power-of-two divides only
    ph = par // 2
    pw = par - 2 * ph
    # validity of grid point (r,c) for output parity (ph,pw)
    mask = ((r >= ph) & (r < ph + H) &
            (c >= pw) & (c < pw + W)).astype(jnp.float32)
    inv = 1.0 / float(B * 4 * H * W)
    cs = jnp.sum(y * mask, axis=0, keepdims=True)    # per (parity, channel)
    # cyclic sums by multiples of Cout aggregate the 4 parity groups of each
    # channel and broadcast the per-channel stat back to every parity column.
    cs = (cs + pltpu.roll(cs, Cout, 1) + pltpu.roll(cs, 2 * Cout, 1)
          + pltpu.roll(cs, 3 * Cout, 1))
    mean = cs * inv
    d = (y - mean) * mask
    vs = jnp.sum(d * d, axis=0, keepdims=True)
    vs = (vs + pltpu.roll(vs, Cout, 1) + pltpu.roll(vs, 2 * Cout, 1)
          + pltpu.roll(vs, 3 * Cout, 1))
    var = vs * inv
    o_ref[...] = jnp.maximum(
        (y - mean) * jax.lax.rsqrt(var + _BN_EPS), 0.0).astype(o_ref.dtype)


def ct_matmul_bn_relu(patches, wc, ridx, cidx, *, B, H, W, Cout, out_dtype):
    M = patches.shape[0]
    return pl.pallas_call(
        functools.partial(_ct_bn_relu_kernel, B=B, H=H, W=W, Cout=Cout),
        out_shape=jax.ShapeDtypeStruct((M, 4 * Cout), out_dtype),
    )(patches, wc, ridx, cidx)


# --------------------------------------------------------------------------
# conv / conv-transpose glue (contiguous im2col in bf16)
# --------------------------------------------------------------------------
def _im2col(x, kh, kw, stride, pad):
    """x:(B,H,W,C) -> patches (B*Ho*Wo, kh*kw*C); feature order = (kh, kw, C)."""
    B, H, W, C = x.shape
    xp = jnp.pad(x, ((0, 0), (pad, pad), (pad, pad), (0, 0)))
    Ho = (H + 2 * pad - kh) // stride + 1
    Wo = (W + 2 * pad - kw) // stride + 1
    cols = [xp[:, i:i + stride * Ho:stride, j:j + stride * Wo:stride, :]
            for i in range(kh) for j in range(kw)]
    patches = jnp.concatenate(cols, axis=-1)          # (B,Ho,Wo, kh*kw*C)
    return patches.reshape(B * Ho * Wo, kh * kw * C), (B, Ho, Wo)


def conv_bn_relu(x_nhwc, w_oihw, stride, pad, out_dtype=jnp.bfloat16):
    """Conv2d(bias=False) -> BatchNorm(train stats) -> ReLU, fused in one matmul."""
    # TODO(synk): patches are still materialized in HBM (bf16) by XLA glue; a
    # fully fused variant would walk the 16 taps through the matmul K grid.
    Cout, Cin, kh, kw = w_oihw.shape
    patches, (B, Ho, Wo) = _im2col(x_nhwc.astype(jnp.bfloat16), kh, kw,
                                   stride, pad)
    wmat = jnp.transpose(w_oihw, (2, 3, 1, 0)).reshape(kh * kw * Cin, Cout)
    y2d = matmul_fused(patches, wmat, act="relu", bn=True, out_dtype=out_dtype)
    return y2d.reshape(B, Ho, Wo, Cout)


def conv_transpose_s2(x_nhwc, w_iohw, *, mode, out_dtype):
    """PyTorch ConvTranspose2d(k=4, stride=2, padding=1, bias=False) by
    output-parity decomposition: each of the 4 output parities is a 2x2-tap
    conv; all four share one im2col over an (H+1)x(W+1) grid and ONE matmul
    with K=4*Cin, N=4*Cout.  mode:
      * "bn_relu": train-mode BatchNorm2d + ReLU fused in the matmul epilogue
        via per-parity validity masks (no separate BN pass / HBM round trip).
      * "tanh":    plain matmul + tanh epilogue (final layer), M split in two
        parallel blocks for v7x's second TensorCore."""
    B, H, W, Cin = x_nhwc.shape
    Cin2, Cout, kh, kw = w_iohw.shape
    assert Cin == Cin2 and kh == 4 and kw == 4
    xp = jnp.pad(x_nhwc.astype(jnp.bfloat16), ((0, 0), (1, 1), (1, 1), (0, 0)))
    cols = [xp[:, dr:dr + H + 1, dc:dc + W + 1, :]
            for dr in (0, 1) for dc in (0, 1)]
    M = B * (H + 1) * (W + 1)
    patches = jnp.concatenate(cols, axis=-1).reshape(M, 4 * Cin)
    # combined sub-kernels: rows ordered (dr, dc, ci), cols ordered (ph, pw, co);
    # parity (ph, pw) tap (dr, dc) uses original kernel tap (3-ph-2dr, 3-pw-2dc).
    wr = w_iohw[:, :, ::-1, ::-1].reshape(Cin, Cout, 2, 2, 2, 2)
    wc = jnp.transpose(wr, (2, 4, 0, 3, 5, 1)).reshape(4 * Cin, 4 * Cout)
    wc = wc.astype(jnp.bfloat16)
    if mode == "bn_relu":
        ridx = jnp.tile(jnp.repeat(jnp.arange(H + 1, dtype=jnp.int32), W + 1),
                        B).reshape(M, 1)
        cidx = jnp.tile(jnp.arange(W + 1, dtype=jnp.int32),
                        B * (H + 1)).reshape(M, 1)
        y = ct_matmul_bn_relu(patches, wc, ridx, cidx, B=B, H=H, W=W,
                              Cout=Cout, out_dtype=out_dtype)
    else:
        y = matmul_fused(patches, wc, act="tanh", bn=False,
                         out_dtype=out_dtype, split_m=True)
    # pixel-shuffle the 4 parity outputs back into (B, 2H, 2W, Cout)
    yg = y.reshape(B, H + 1, W + 1, 2, 2, Cout)
    rows = []
    for ph in (0, 1):
        rows.append(jnp.stack(
            [yg[:, ph:ph + H, pw:pw + W, ph, pw, :] for pw in (0, 1)], axis=3))
    out = jnp.stack(rows, axis=2)                     # (B, H, 2, W, 2, Cout)
    return out.reshape(B, 2 * H, 2 * W, Cout)


# --------------------------------------------------------------------------
# Full VAE forward
# --------------------------------------------------------------------------
def vae_forward(params, x_nchw, noise_key):
    x = jnp.transpose(x_nchw, (0, 2, 3, 1)).astype(jnp.bfloat16)  # NCHW -> NHWC

    # encoder: 4 x [conv k4 s2 p1 -> BN -> ReLU], each one fused pallas_call
    h = x
    for w in params["enc"]:
        h = conv_bn_relu(h, w, stride=2, pad=1, out_dtype=jnp.bfloat16)

    # mu / sigma head (conv k4 s1 p0 on the 4x4 map -> 1x1) + reparameterize,
    # fused into a single matmul against [mu_w | sigma_w].
    # TODO(synk): torch.cuda FloatTensor.normal_() has no reproducible JAX
    # equivalent; noise comes from jax.random.normal instead.
    B = h.shape[0]
    a_head = h.reshape(B, -1)                                     # (B, 4*4*256)
    Z = params["mu"].shape[0]
    wmu = jnp.transpose(params["mu"], (0, 2, 3, 1)).reshape(Z, -1)
    wsg = jnp.transpose(params["sigma"], (0, 2, 3, 1)).reshape(Z, -1)
    w_head = jnp.concatenate([wmu, wsg], axis=0).T                # (4096, 2Z)
    eps = jax.random.normal(noise_key, (B, Z), jnp.float32)
    mv, z = head_matmul_reparam(a_head, w_head, eps)              # (B,2Z), (B,Z)
    mu2d, lv2d = mv[:, :Z], mv[:, Z:]

    # decoder layer 1: ConvTranspose k4 s1 p0 on a 1x1 map == plain matmul
    dec_ws = params["dec"]
    w0 = dec_ws[0]
    Cin0, Cout0, k0, _ = w0.shape
    w0m = jnp.transpose(w0, (0, 2, 3, 1)).reshape(Cin0, k0 * k0 * Cout0)
    y = matmul_fused(z, w0m, act="none", bn=False, out_dtype=jnp.bfloat16)
    d = bn_act(y.reshape(B * k0 * k0, Cout0), act="relu",
               out_dtype=jnp.bfloat16).reshape(B, k0, k0, Cout0)

    # middle decoder layers: ConvTranspose k4 s2 p1 -> BN -> ReLU, all fused
    for w in dec_ws[1:-1]:
        d = conv_transpose_s2(d, w, mode="bn_relu", out_dtype=jnp.bfloat16)

    # final layer: ConvTranspose k4 s2 p1 -> Tanh (tanh fused in matmul epilogue)
    out_nhwc = conv_transpose_s2(d, dec_ws[-1], mode="tanh",
                                 out_dtype=jnp.float32)

    out = jnp.transpose(out_nhwc, (0, 3, 1, 2))                   # NHWC -> NCHW
    mu = mu2d.reshape(B, Z, 1, 1)
    logvar = lv2d.reshape(B, Z, 1, 1)
    return out, mu, logvar


# --------------------------------------------------------------------------
if __name__ == "__main__":
    key = jax.random.PRNGKey(0)
    keys = jax.random.split(key, 20)

    def w(k, shape, scale=0.02):
        return scale * jax.random.normal(k, shape, jnp.float32)

    # Parameter shapes exactly as in the PyTorch module (all convs bias=False).
    params = {
        "enc": [w(keys[0], (32, 3, 4, 4)),
                w(keys[1], (64, 32, 4, 4)),
                w(keys[2], (128, 64, 4, 4)),
                w(keys[3], (256, 128, 4, 4))],
        "mu": w(keys[4], (1024, 256, 4, 4)),
        "sigma": w(keys[5], (1024, 256, 4, 4)),
        "dec": [w(keys[6], (1024, 256, 4, 4)),  # ConvTranspose weights: (Cin, Cout, kh, kw)
                w(keys[7], (256, 128, 4, 4)),
                w(keys[8], (128, 64, 4, 4)),
                w(keys[9], (64, 32, 4, 4)),
                w(keys[10], (32, 3, 4, 4))],
    }

    # Architecture (4x stride-2 downsample then kernel-4 valid conv) implies 64x64 input.
    x = jax.random.normal(keys[11], (2, 3, 64, 64), jnp.float32)

    # ---- numerical checks of the conv / conv-transpose decompositions ------
    xt = jax.random.normal(keys[13], (2, 16, 16, 8), jnp.float32)

    # encoder conv (k4 s2 p1) + BN + ReLU vs XLA reference
    wt_c = w(keys[14], (16, 8, 4, 4), scale=0.1)
    rc = jax.lax.conv_general_dilated(
        xt, jnp.transpose(wt_c, (2, 3, 1, 0)), window_strides=(2, 2),
        padding=((1, 1), (1, 1)), dimension_numbers=("NHWC", "HWIO", "NHWC"))
    mc = jnp.mean(rc, axis=(0, 1, 2), keepdims=True)
    vc = jnp.mean((rc - mc) ** 2, axis=(0, 1, 2), keepdims=True)
    ref_c = jnp.maximum((rc - mc) * jax.lax.rsqrt(vc + _BN_EPS), 0.0)
    got_c = conv_bn_relu(xt, wt_c, stride=2, pad=1, out_dtype=jnp.float32)
    assert float(jnp.max(jnp.abs(got_c - ref_c))) < 8e-2

    # parity-decomposed ConvTranspose (k4 s2 p1) + fused masked BN + ReLU
    wt_b = w(keys[15], (8, 32, 4, 4), scale=0.1)
    rb = jax.lax.conv_general_dilated(
        xt, jnp.transpose(wt_b[:, :, ::-1, ::-1], (2, 3, 0, 1)),
        window_strides=(1, 1), padding=((2, 2), (2, 2)), lhs_dilation=(2, 2),
        dimension_numbers=("NHWC", "HWIO", "NHWC"))
    mb = jnp.mean(rb, axis=(0, 1, 2), keepdims=True)
    vb = jnp.mean((rb - mb) ** 2, axis=(0, 1, 2), keepdims=True)
    ref_b = jnp.maximum((rb - mb) * jax.lax.rsqrt(vb + _BN_EPS), 0.0)
    got_b = conv_transpose_s2(xt, wt_b, mode="bn_relu", out_dtype=jnp.float32)
    assert float(jnp.max(jnp.abs(got_b - ref_b))) < 8e-2

    # parity-decomposed ConvTranspose + tanh (exercises the split-M path)
    wt_t = w(keys[16], (8, 3, 4, 4), scale=0.1)
    rt = jax.lax.conv_general_dilated(
        xt, jnp.transpose(wt_t[:, :, ::-1, ::-1], (2, 3, 0, 1)),
        window_strides=(1, 1), padding=((2, 2), (2, 2)), lhs_dilation=(2, 2),
        dimension_numbers=("NHWC", "HWIO", "NHWC"))
    got_t = conv_transpose_s2(xt, wt_t, mode="tanh", out_dtype=jnp.float32)
    assert float(jnp.max(jnp.abs(got_t - jnp.tanh(rt)))) < 5e-2

    # ---- full forward -------------------------------------------------------
    fwd = jax.jit(vae_forward)
    out, mu, logvar = fwd(params, x, keys[12])
    jax.block_until_ready((out, mu, logvar))

    assert out.shape == (2, 3, 64, 64)
    assert mu.shape == (2, 1024, 1, 1)
    assert logvar.shape == (2, 1024, 1, 1)
    assert bool(jnp.all(jnp.isfinite(out)))
    assert bool(jnp.all(jnp.abs(out) <= 1.0))
    assert bool(jnp.all(jnp.isfinite(mu))) and bool(jnp.all(jnp.isfinite(logvar)))
    print("KERNEL_OK")
</pallas_src>

<mosaic_0001>
module attributes {stable_mosaic.version = 11 : i64} {
  func.func @_mm_fused_kernel(%arg0: i32, %arg1: i32, %arg2: memref<128x128xbf16, #tpu.memory_space<vmem>>, %arg3: memref<128x128xbf16, #tpu.memory_space<vmem>>, %arg4: memref<128x128xf32, #tpu.memory_space<vmem>>) attributes {dimension_semantics = [#tpu.dimension_semantics<parallel>, #tpu.dimension_semantics<parallel>], iteration_bounds = array<i64: 1, 1>, scalar_prefetch = 0 : i64, scratch_operands = 0 : i64, tpu.core_type = #tpu.core_type<tc>, window_params = [{transform_indices = @transform_0, window_bounds = array<i64: 128, 128>}, {transform_indices = @transform_1, window_bounds = array<i64: 128, 128>}, {transform_indices = @transform_2, window_bounds = array<i64: 128, 128>}]} {
    %c0 = arith.constant 0 : index
    %c0_0 = arith.constant 0 : index
    %0 = vector.load %arg2[%c0, %c0_0] : memref<128x128xbf16, #tpu.memory_space<vmem>>, vector<128x128xbf16>
    %c0_1 = arith.constant 0 : index
    %c0_2 = arith.constant 0 : index
    %1 = vector.load %arg3[%c0_1, %c0_2] : memref<128x128xbf16, #tpu.memory_space<vmem>>, vector<128x128xbf16>
    %cst = arith.constant dense<0.000000e+00> : vector<128x128xf32>
    %2 = tpu.matmul %0, %1, %cst {dimension_numbers = #tpu.dot_dimension_numbers<[1], [0], [0], [1], [0, 0, 1, 1], [], []>} : vector<128x128xbf16>, vector<128x128xbf16>, vector<128x128xf32> -> vector<128x128xf32>
    %cst_3 = arith.constant dense<0.000000e+00> : vector<128xf32>
    %3 = vector.multi_reduction <add>, %2, %cst_3 [0] : vector<128x128xf32> to vector<128xf32>
    %4 = vector.shape_cast %3 : vector<128xf32> to vector<1x128xf32>
    %cst_4 = arith.constant 7.812500e-03 : f32
    %5 = vector.broadcast %cst_4 : f32 to vector<1x128xf32>
    %6 = arith.mulf %4, %5 : vector<1x128xf32>
    %7 = vector.broadcast %6 : vector<1x128xf32> to vector<128x128xf32>
    %8 = arith.subf %2, %7 : vector<128x128xf32>
    %9 = arith.mulf %8, %8 : vector<128x128xf32>
    %cst_5 = arith.constant dense<0.000000e+00> : vector<128xf32>
    %10 = vector.multi_reduction <add>, %9, %cst_5 [0] : vector<128x128xf32> to vector<128xf32>
    %11 = vector.shape_cast %10 : vector<128xf32> to vector<1x128xf32>
    %cst_6 = arith.constant 7.812500e-03 : f32
    %12 = vector.broadcast %cst_6 : f32 to vector<1x128xf32>
    %13 = arith.mulf %11, %12 : vector<1x128xf32>
    %14 = vector.broadcast %6 : vector<1x128xf32> to vector<128x128xf32>
    %15 = arith.subf %2, %14 : vector<128x128xf32>
    %cst_7 = arith.constant 9.99999974E-6 : f32
    %16 = vector.broadcast %cst_7 : f32 to vector<1x128xf32>
    %17 = arith.addf %13, %16 : vector<1x128xf32>
    %18 = math.rsqrt %17 : vector<1x128xf32>
    %19 = vector.broadcast %18 : vector<1x128xf32> to vector<128x128xf32>
    %20 = arith.mulf %15, %19 : vector<128x128xf32>
    %cst_8 = arith.constant 0.000000e+00 : f32
    %21 = vector.broadcast %cst_8 : f32 to vector<128x128xf32>
    %22 = arith.maximumf %20, %21 : vector<128x128xf32>
    %c0_9 = arith.constant 0 : index
    %c0_10 = arith.constant 0 : index
    %23 = vector.load %arg4[%c0_9, %c0_10] : memref<128x128xf32, #tpu.memory_space<vmem>>, vector<128x128xf32>
    tpu.vector_store %arg4[%c0_9, %c0_10], %22 {strides = array<i32>} : memref<128x128xf32, #tpu.memory_space<vmem>>, vector<128x128xf32>,
    return
  }
  func.func @transform_0(%arg0: i32, %arg1: i32) -> (i32, i32) {
    %c0_i32 = arith.constant 0 : i32
    %c0_i32_0 = arith.constant 0 : i32
    return %arg0, %c0_i32 : i32, i32
  }
  func.func @transform_1(%arg0: i32, %arg1: i32) -> (i32, i32) {
    %c0_i32 = arith.constant 0 : i32
    %c0_i32_0 = arith.constant 0 : i32
    return %c0_i32, %arg1 : i32, i32
  }
  func.func @transform_2(%arg0: i32, %arg1: i32) -> (i32, i32) {
    %c0_i32 = arith.constant 0 : i32
    return %arg0, %arg1 : i32, i32
  }
}

</mosaic_0001>

<bundles_post_ra>
// kernel: tpu_custom_call.1
= control target key start
LH: loop header
LB: loop body
LE: loop exit
PB: predicated region body
PF: predicated region fallthrough
CT: control target
= control target key end

     0   :  { %7 = vsyncpa [#allocation3], 0  ;;  %s619_s0 = inlined_call_operand.hbm [shape: bf16[128,128], index: 0, kind: input, shape index: {}]   ;;  %s620_s1 = inlined_call_operand.hbm [shape: bf16[128,128], index: 1, kind: input, shape index: {}]   ;;  %s621_s2 = inlined_call_operand.hbm [shape: f32[128,128], index: 2, kind: output, shape index: {}]  }
   0x1   :  { %8 = vsyncpa [#allocation6], 0 }
   0x2   :  { %9 = vsyncpa [#allocation4], 0  ;;  %s581_s9 = smov [#allocation2]  }
   0x3   :  { %s15_s10 = sshll.u32 %s581_s9, 4  ;;  %s16_s10 = int_to_ptr.vmem [resolvable:$true] %s15_s10 }
   0x4   :  { %s523_s11 = scalar_lea.vmem %s16_s10, 1024  ;;  %p528_p1 = scmp.lt.s32.totalorder %s16_s10, %s16_s10 }
   0x5   :  { %p524_p0 = scmp.ne.s32.totalorder %s16_s10, %s523_s11  ;;  %p529_p2 = scmp.lt.s32.totalorder %s523_s11, %s523_s11 }
   0x7   :  { %p530_p3 = por %p529_p2, %p528_p1 }
   0x9   :  { %p531_p4 = pnand %p530_p3, %p524_p0 }
   0xb   :  { %534 = shalt.err (!%p531_p4)
}
   0xc   :  { %s582_s12 = smov 64   ;;  %s583_s13 = smov 4  }
   0xd   :  { %21 = dma.hbm_to_vmem [thread:$0]  %s619_s0, 1024, %s16_s10, [#allocation3], %s582_s12, %s582_s12, %s583_s13  }
   0xe   :  { %s584_s16 = smov [#allocation5]  }
   0xf   :  { %s27_s17 = sshll.u32 %s584_s16, 4  ;;  %s28_s17 = int_to_ptr.vmem [resolvable:$true] %s27_s17 }
  0x10   :  { %s543_s18 = scalar_lea.vmem %s28_s17, 1024  ;;  %p548_p6 = scmp.lt.s32.totalorder %s28_s17, %s28_s17 }
  0x11   :  { %p544_p5 = scmp.ne.s32.totalorder %s28_s17, %s543_s18  ;;  %p549_p7 = scmp.lt.s32.totalorder %s543_s18, %s543_s18 }
  0x13   :  { %p550_p8 = por %p549_p7, %p548_p6 }
  0x15   :  { %p551_p9 = pnand %p550_p8, %p544_p5 }
  0x17   :  { %554 = shalt.err (!%p551_p9)
}
  0x18   :  { %33 = dma.hbm_to_vmem [thread:$0]  %s620_s1, 1024, %s28_s17, [#allocation6], %s582_s12, %s582_s12, %s583_s13  }
  0x19   :  { %575 = dma.done.wait [#allocation3], 1024  }
  0x1a   :  { %576 = vsyncadd [#allocation3], 4294966272 }
  0x1b   :  { %577 = dma.done.wait [#allocation6], 1024  }
  0x1c   :  { %578 = vsyncadd [#allocation6], 4294966272  ;;  %v497_v0 = vld [vmem:[#allocation5 + $0x38] sm:$0xff]   ;;  %v498_v1 = vld [vmem:[#allocation5 + $0x30] sm:$0xff]   ;;  %s585_s0 = smov [#allocation7]  }
  0x1d   :  { %442 = vmatprep.subr.bf16.mxu0 %v497_v0  ;;  %474 = vmatprep.subr.bf16.mxu1 %v497_v0  ;;  %v499_v2 = vld [vmem:[#allocation5 + $0x28] sm:$0xff]   ;;  %v500_v3 = vld [vmem:[#allocation5 + $0x20] sm:$0xff]   ;;  %v501_v5 = vld [vmem:[#allocation5 + $0x18] sm:$0xff]   ;;  %s397_s1 = sshll.u32 %s585_s0, 4  ;;  %s609_s1 = int_to_ptr.vmem [resolvable:$true] %s397_s1 }
  0x1e   :  { %443 = vmatpush3.bf16.msra.mxu0 %v497_v0  ;;  %482 = vmatpush3.bf16.msra.mxu1 %v497_v0  ;;  %v505_v4 = vld [vmem:[#allocation2] sm:$0xff]   ;;  %v502_v7 = vld [vmem:[#allocation5 + $0x10] sm:$0xff]   ;;  %v503_v8 = vld [vmem:[#allocation5 + $0x8] sm:$0xff]   ;;  %s555_s21 = scalar_lea.vmem %s609_s1, 2048  ;;  %p560_p11 = scmp.lt.s32.totalorder %s609_s1, %s609_s1 }
  0x1f   :  { %444 = vmatprep.subr.bf16.mxu0 %v498_v1  ;;  %475 = vmatprep.subr.bf16.mxu1 %v498_v1  ;;  %v509_v6 = vld [vmem:[#allocation2 + $0x20] sm:$0xff]   ;;  %v506_v10 = vld [vmem:[#allocation2 + $0x8] sm:$0xff]   ;;  %v507_v12 = vld [vmem:[#allocation2 + $0x10] sm:$0xff]   ;;  %p556_p10 = scmp.ne.s32.totalorder %s609_s1, %s555_s21  ;;  %p561_p12 = scmp.lt.s32.totalorder %s555_s21, %s555_s21 }
  0x20   :  { %458 = vmatprep.mubr.bf16.mxu0 %v505_v4  ;;  %466 = vmatprep.mubr.bf16.mxu1 %v509_v6  ;;  %v504_v9 = vld [vmem:[#allocation5] sm:$0xff]   ;;  %v510_v11 = vld [vmem:[#allocation2 + $0x28] sm:$0xff]   ;;  %v511_v13 = vld [vmem:[#allocation2 + $0x30] sm:$0xff]  }
  0x21   :  { %v508_v14 = vld [vmem:[#allocation2 + $0x18] sm:$0xff]   ;;  %p562_p13 = por %p561_p12, %p560_p11 }
  0x22   :  { %445 = vmatpush3.bf16.msra.mxu0 %v498_v1  ;;  %483 = vmatpush3.bf16.msra.mxu1 %v498_v1  ;;  %v512_v15 = vld [vmem:[#allocation2 + $0x38] sm:$0xff]  }
  0x23   :  { %446 = vmatprep.subr.bf16.mxu0 %v499_v2  ;;  %476 = vmatprep.subr.bf16.mxu1 %v499_v2  ;;  %p563_p0 = pnand %p562_p13, %p556_p10 }
  0x26   :  { %447 = vmatpush3.bf16.msra.mxu0 %v499_v2  ;;  %484 = vmatpush3.bf16.msra.mxu1 %v499_v2 }
  0x27   :  { %448 = vmatprep.subr.bf16.mxu0 %v500_v3  ;;  %477 = vmatprep.subr.bf16.mxu1 %v500_v3 }
  0x2a   :  { %449 = vmatpush3.bf16.msra.mxu0 %v500_v3  ;;  %485 = vmatpush3.bf16.msra.mxu1 %v500_v3 }
  0x2b   :  { %450 = vmatprep.subr.bf16.mxu0 %v501_v5  ;;  %478 = vmatprep.subr.bf16.mxu1 %v501_v5 }
  0x2e   :  { %451 = vmatpush3.bf16.msra.mxu0 %v501_v5  ;;  %486 = vmatpush3.bf16.msra.mxu1 %v501_v5 }
  0x2f   :  { %452 = vmatprep.subr.bf16.mxu0 %v502_v7  ;;  %479 = vmatprep.subr.bf16.mxu1 %v502_v7 }
  0x32   :  { %453 = vmatpush3.bf16.msra.mxu0 %v502_v7  ;;  %487 = vmatpush3.bf16.msra.mxu1 %v502_v7 }
  0x33   :  { %454 = vmatprep.subr.bf16.mxu0 %v503_v8  ;;  %480 = vmatprep.subr.bf16.mxu1 %v503_v8 }
  0x36   :  { %455 = vmatpush3.bf16.msra.mxu0 %v503_v8  ;;  %488 = vmatpush3.bf16.msra.mxu1 %v503_v8 }
  0x37   :  { %456 = vmatprep.subr.bf16.mxu0 %v504_v9  ;;  %481 = vmatprep.subr.bf16.mxu1 %v504_v9 }
  0x3a   :  { %457 = vmatpush3.bf16.msra.mxu0 %v504_v9  ;;  %489 = vmatpush3.bf16.msra.mxu1 %v504_v9 }
  0x3d   :  { %459 = vmatmul.mubr.bf16.vlgmr.msra.gmra.mxu0 %v506_v10  ;;  %467 = vmatmul.mubr.bf16.vlgmr.msra.gmra.mxu1 %v510_v11 }
  0x3e   :  { %462 = vmatprep.mubr.bf16.mxu0 %v507_v12  ;;  %470 = vmatprep.mubr.bf16.mxu1 %v511_v13 }
  0x45   :  { %463 = vmatmul.mubr.bf16.gmra.mxu0 %v508_v14  ;;  %471 = vmatmul.mubr.bf16.gmra.mxu1 %v512_v15 }
  0xfd   :  { %v460_v16 = vpop.f32.mrf.mxu0  ;;  %v468_v18 = vpop.f32.mrf.mxu1 }
  0xff   :  { %v203_v17 = vpop.f32.mrf.mxu0  ;;  %v235_v21 = vpop.f32.mrf.mxu1 }
 0x101   :  { %v461_v19 = vpop.f32.mrf.mxu0  ;;  %v469_v26 = vpop.f32.mrf.mxu1 }
 0x103   :  { %v206_v20 = vpop.f32.mrf.mxu0  ;;  %v238_v31 = vpop.f32.mrf.mxu1 }
 0x104   :  { %v266_v22 = vadd.f32 %v206_v20, %v203_v17 }
 0x105   :  { %v464_v23 = vpop.f32.mrf.mxu0  ;;  %v472_v34 = vpop.f32.mrf.mxu1 }
 0x106   :  { %v267_v24 = vadd.f32 %v460_v16, %v266_v22 }
 0x107   :  { %v219_v25 = vpop.f32.mrf.mxu0  ;;  %v251_v37 = vpop.f32.mrf.mxu1 }
 0x108   :  { %v268_v27 = vadd.f32 %v461_v19, %v267_v24 }
 0x109   :  { %v465_v28 = vpop.f32.mrf.mxu0  ;;  %v473_v40 = vpop.f32.mrf.mxu1 }
 0x10a   :  { %v269_v29 = vadd.f32 %v268_v27, %v219_v25 }
 0x10b   :  { %v222_v30 = vpop.f32.mrf.mxu0  ;;  %v254_v43 = vpop.f32.mrf.mxu1 }
 0x10c   :  { %v270_v32 = vadd.f32 %v269_v29, %v222_v30 }
 0x10e   :  { %v271_v33 = vadd.f32 %v464_v23, %v270_v32 }
 0x110   :  { %v272_v35 = vadd.f32 %v465_v28, %v271_v33 }
 0x112   :  { %v273_v36 = vadd.f32 %v272_v35, %v235_v21 }
 0x114   :  { %v274_v38 = vadd.f32 %v273_v36, %v238_v31 }
 0x116   :  { %v275_v39 = vadd.f32 %v468_v18, %v274_v38 }
 0x118   :  { %v276_v41 = vadd.f32 %v469_v26, %v275_v39 }
 0x11a   :  { %v277_v42 = vadd.f32 %v276_v41, %v251_v37 }
 0x11c   :  { %v278_v44 = vadd.f32 %v277_v42, %v254_v43 }
 0x11e   :  { %v279_v45 = vadd.f32 %v472_v34, %v278_v44 }
 0x120   :  { %v280_v46 = vadd.f32 %v473_v40, %v279_v45 }
 0x122   :  { %v281_v47 = vrot.slane %v280_v46, 4 }
 0x124   :  { %v282_v48 = vadd.f32 %v281_v47, %v280_v46 }
 0x126   :  { %v283_v49 = vrot.slane %v282_v48, 2 }
 0x128   :  { %v284_v50 = vadd.f32 %v283_v49, %v282_v48 }
 0x12a   :  { %v285_v51 = vrot.slane %v284_v50, 1 }
 0x12c   :  { %v286_v52 = vadd.f32 %v285_v51, %v284_v50 }
 0x12e   :  { %v287_v53 = vmul.f32 0.0078125, %v286_v52 }
 0x130   :  { %v288_v54 = vsub.f32 %v203_v17, %v287_v53  ;;  %v289_v55 = vsub.f32 %v206_v20, %v287_v53  ;;  %v290_v56 = vsub.f32 %v460_v16, %v287_v53  ;;  %v291_v59 = vsub.f32 %v461_v19, %v287_v53 }
 0x131   :  { %v292_v60 = vsub.f32 %v219_v25, %v287_v53  ;;  %v293_v63 = vsub.f32 %v222_v30, %v287_v53  ;;  %v294_v2 = vsub.f32 %v464_v23, %v287_v53  ;;  %v295_v5 = vsub.f32 %v465_v28, %v287_v53 }
 0x132   :  { %v304_v57 = vmul.f32 %v288_v54, %v288_v54  ;;  %v305_v58 = vmul.f32 %v289_v55, %v289_v55  ;;  %v306_v61 = vmul.f32 %v290_v56, %v290_v56  ;;  %v307_v0 = vmul.f32 %v291_v59, %v291_v59 }
 0x133   :  { %v308_v3 = vmul.f32 %v292_v60, %v292_v60  ;;  %v309_v6 = vmul.f32 %v293_v63, %v293_v63  ;;  %v296_v8 = vsub.f32 %v235_v21, %v287_v53  ;;  %v310_v9 = vmul.f32 %v294_v2, %v294_v2 }
 0x134   :  { %v320_v62 = vadd.f32 %v305_v58, %v304_v57  ;;  %v297_v11 = vsub.f32 %v238_v31, %v287_v53  ;;  %v311_v12 = vmul.f32 %v295_v5, %v295_v5  ;;  %v298_v14 = vsub.f32 %v468_v18, %v287_v53 }
 0x135   :  { %v312_v15 = vmul.f32 %v296_v8, %v296_v8  ;;  %v299_v17 = vsub.f32 %v469_v26, %v287_v53  ;;  %v300_v22 = vsub.f32 %v251_v37, %v287_v53  ;;  %v301_v25 = vsub.f32 %v254_v43, %v287_v53 }
 0x136   :  { %v321_v1 = vadd.f32 %v320_v62, %v306_v61  ;;  %v313_v19 = vmul.f32 %v297_v11, %v297_v11  ;;  %v314_v24 = vmul.f32 %v298_v14, %v298_v14  ;;  %v302_v29 = vsub.f32 %v472_v34, %v287_v53 }
 0x137   :  { %v315_v27 = vmul.f32 %v299_v17, %v299_v17  ;;  %v316_v30 = vmul.f32 %v300_v22, %v300_v22  ;;  %v303_v32 = vsub.f32 %v473_v40, %v287_v53  ;;  %v317_v33 = vmul.f32 %v301_v25, %v301_v25 }
 0x138   :  { %v322_v4 = vadd.f32 %v321_v1, %v307_v0  ;;  %v318_v35 = vmul.f32 %v302_v29, %v302_v29 }
 0x139   :  { %v319_v18 = vmul.f32 %v303_v32, %v303_v32 }
 0x13a   :  { %v323_v7 = vadd.f32 %v322_v4, %v308_v3 }
 0x13c   :  { %v324_v10 = vadd.f32 %v323_v7, %v309_v6 }
 0x13e   :  { %v325_v13 = vadd.f32 %v324_v10, %v310_v9 }
 0x140   :  { %v326_v16 = vadd.f32 %v325_v13, %v311_v12 }
 0x142   :  { %v327_v20 = vadd.f32 %v326_v16, %v312_v15 }
 0x144   :  { %v328_v23 = vadd.f32 %v327_v20, %v313_v19 }
 0x146   :  { %v329_v28 = vadd.f32 %v328_v23, %v314_v24 }
 0x148   :  { %v330_v21 = vadd.f32 %v329_v28, %v315_v27 }
 0x14a   :  { %v331_v31 = vadd.f32 %v330_v21, %v316_v30 }
 0x14c   :  { %v332_v36 = vadd.f32 %v331_v31, %v317_v33 }
 0x14e   :  { %v333_v38 = vadd.f32 %v332_v36, %v318_v35 }
 0x150   :  { %v334_v39 = vadd.f32 %v333_v38, %v319_v18 }
 0x152   :  { %v335_v26 = vrot.slane %v334_v39, 4 }
 0x154   :  { %v336_v41 = vadd.f32 %v335_v26, %v334_v39 }
 0x156   :  { %v337_v42 = vrot.slane %v336_v41, 2 }
 0x158   :  { %v338_v37 = vadd.f32 %v337_v42, %v336_v41 }
 0x15a   :  { %v339_v44 = vrot.slane %v338_v37, 1 }
 0x15c   :  { %v340_v45 = vadd.f32 %v339_v44, %v338_v37 }
 0x15e   :  { %v341_v43 = vmul.f32 0.0078125, %v340_v45 }
 0x160   :  { %v342_v46 = vadd.f32 1e-05, %v341_v43 }
 0x162   :  { %513 = vrsqrt.f32 %v342_v46 }
 0x16f   :  { %v514_v34 = vpop.eup %513 }
 0x170   :  { %v344_v47 = vmul.f32 %v514_v34, %v288_v54  ;;  %v345_v48 = vmul.f32 %v514_v34, %v289_v55  ;;  %v346_v40 = vmul.f32 %v514_v34, %v290_v56  ;;  %v347_v49 = vmul.f32 %v514_v34, %v291_v59 }
 0x171   :  { %v348_v50 = vmul.f32 %v514_v34, %v292_v60  ;;  %v349_v51 = vmul.f32 %v514_v34, %v293_v63  ;;  %v350_v52 = vmul.f32 %v514_v34, %v294_v2  ;;  %v351_v53 = vmul.f32 %v514_v34, %v295_v5 }
 0x172   :  { %v352_v57 = vmul.f32 %v514_v34, %v296_v8  ;;  %v353_v58 = vmul.f32 %v514_v34, %v297_v11  ;;  %v354_v61 = vmul.f32 %v514_v34, %v298_v14  ;;  %v355_v62 = vmul.f32 %v514_v34, %v299_v17 }
 0x173   :  { %v356_v0 = vmul.f32 %v514_v34, %v300_v22  ;;  %v357_v1 = vmul.f32 %v514_v34, %v301_v25  ;;  %v358_v3 = vmul.f32 %v514_v34, %v302_v29  ;;  %v359_v4 = vmul.f32 %v514_v34, %v303_v32 }
 0x174   :  { %v360_v6 = vmax.f32 %v344_v47, 0.0  ;;  %v361_v7 = vmax.f32 %v345_v48, 0.0  ;;  %v362_v54 = vmax.f32 %v346_v40, 0.0  ;;  %v363_v55 = vmax.f32 %v347_v49, 0.0 }
 0x175   :  { %v364_v56 = vmax.f32 %v348_v50, 0.0  ;;  %v365_v59 = vmax.f32 %v349_v51, 0.0  ;;  %v366_v60 = vmax.f32 %v350_v52, 0.0  ;;  %v367_v63 = vmax.f32 %v351_v53, 0.0 }
 0x176   :  { %v368_v2 = vmax.f32 %v352_v57, 0.0  ;;  %v369_v5 = vmax.f32 %v353_v58, 0.0  ;;  %v370_v8 = vmax.f32 %v354_v61, 0.0  ;;  %v371_v9 = vmax.f32 %v355_v62, 0.0  ;;  %376 = vst [vmem:[#allocation7] sm:$0xff] %v360_v6  ;;  %377 = vst [vmem:[#allocation7 + $0x8] sm:$0xff] %v361_v7 }
 0x177   :  { %378 = vst [vmem:[#allocation7 + $0x10] sm:$0xff] %v362_v54  ;;  %379 = vst [vmem:[#allocation7 + $0x18] sm:$0xff] %v363_v55  ;;  %v372_v10 = vmax.f32 %v356_v0, 0.0  ;;  %v373_v11 = vmax.f32 %v357_v1, 0.0  ;;  %v374_v12 = vmax.f32 %v358_v3, 0.0  ;;  %v375_v13 = vmax.f32 %v359_v4, 0.0 }
 0x178   :  { %380 = vst [vmem:[#allocation7 + $0x20] sm:$0xff] %v364_v56  ;;  %381 = vst [vmem:[#allocation7 + $0x28] sm:$0xff] %v365_v59 }
 0x179   :  { %382 = vst [vmem:[#allocation7 + $0x30] sm:$0xff] %v366_v60  ;;  %383 = vst [vmem:[#allocation7 + $0x38] sm:$0xff] %v367_v63 }
 0x17a   :  { %384 = vst [vmem:[#allocation7 + $0x40] sm:$0xff] %v368_v2  ;;  %385 = vst [vmem:[#allocation7 + $0x48] sm:$0xff] %v369_v5 }
 0x17b   :  { %386 = vst [vmem:[#allocation7 + $0x50] sm:$0xff] %v370_v8  ;;  %387 = vst [vmem:[#allocation7 + $0x58] sm:$0xff] %v371_v9 }
 0x17c   :  { %388 = vst [vmem:[#allocation7 + $0x60] sm:$0xff] %v372_v10  ;;  %389 = vst [vmem:[#allocation7 + $0x68] sm:$0xff] %v373_v11 }
 0x17d   :  { %390 = vst [vmem:[#allocation7 + $0x70] sm:$0xff] %v374_v12  ;;  %391 = vst [vmem:[#allocation7 + $0x78] sm:$0xff] %v375_v13 }
 0x17e   :  { %566 = shalt.err (!%p563_p0)
}
 0x17f   :  { %s586_s22 = smov 128   ;;  %s587_s23 = smov 8  }
 0x180   :  { %403 = dma.vmem_to_hbm [thread:$0]  %s609_s1, 2048, %s621_s2, [#allocation4], %s586_s22, %s586_s22, %s587_s23  }
 0x181   :  { %579 = dma.done.wait [#allocation4], 2048  }
 0x182   :  { %580 = vsyncadd [#allocation4], 4294965248 }
 0x183   :  { %407 = vsyncpa [#allocation3], 1 }
 0x184   :  { %408 = vsyncpa [#allocation6], 1 }
 0x185   :  { %409 = vsyncpa [#allocation4], 1 }

</bundles_post_ra>
